<compile_context>
chip_gen: v5e
topology: v5e:2x2
jax: 0.10.0
libtpu: 0.0.40
codegen_flags: <defaults>
</compile_context>

<pallas_src>
import functools

import jax
import jax.numpy as jnp
import numpy as np
from jax.experimental import pallas as pl
from jax.experimental.pallas import tpu as pltpu

# Loss hyper-parameters (as used inside SymmetricUnifiedFocalLoss.__init__).
WEIGHT = 0.5
DELTA = 0.6
GAMMA = 0.5           # == 0.5  ->  pow(1 - p, gamma) == sqrt(1 - p)
EPS = 1e-07

LANES = 256           # 2 class channels interleaved across lanes (even=class0, odd=class1)
SUBLANES = 8


def _chip_config():
    """Per-generation (ncores, max_block_rows, vmem_limit_bytes, dimension_semantics)."""
    vmem_cap = 128 * 1024 * 1024
    try:
        info = pltpu.get_tpu_info()
        vmem_cap = int(getattr(info, "vmem_capacity_bytes", vmem_cap))
    except Exception:
        pass
    try:
        kind = jax.devices()[0].device_kind.lower()
    except Exception:
        kind = ""
    core_parallel = getattr(pltpu, "CORE_PARALLEL", None)
    arbitrary = getattr(pltpu, "ARBITRARY", "arbitrary")
    is_v7x = ("7" in kind) or (vmem_cap <= 80 * 1024 * 1024)
    if is_v7x and core_parallel is not None:
        # v7x: 2 TensorCores, 64 MiB VMEM per TC -> cap tile + VMEM budget and
        # shard the leading grid axis across cores with CORE_PARALLEL.
        # TODO(synk): add pipeline_mode=pl.Buffered(3) to the input specs if
        # xprof shows exposed DMA under 2-TC HBM contention.
        return 2, 4096, 48 * 1024 * 1024, (core_parallel, arbitrary)
    # v5e / v6e: single TensorCore, 128 MiB VMEM -> bigger tiles, no core-axis
    # mask/clamp overhead (extent-1 leading axis is free).
    return 1, 8192, 96 * 1024 * 1024, ("arbitrary", "arbitrary")


def _choose_block_rows(rows, max_block_rows, ncores):
    """Largest sublane-aligned block that divides `rows` with nblocks % ncores == 0,
    so the in-kernel ragged mask and the clamped spare grid step are unnecessary."""
    cap = max(SUBLANES, (min(max_block_rows, rows) // SUBLANES) * SUBLANES)
    for br in range(cap, SUBLANES - 1, -SUBLANES):
        if rows % br == 0 and (rows // br) % ncores == 0:
            return br
    return cap  # fall back to masked path


def _focal_sum_kernel(p_ref, t_ref, o_ref, acc_ref, *,
                      rows, block_rows, blocks_per_core, needs_mask):
    """Accumulates sum over elements of w_class * (1-p)^gamma * (-t*log p);
    one lane-dense (8, LANES) partial per core, summed in the wrapper."""
    c = pl.program_id(0)          # core axis (CORE_PARALLEL on v7x, extent 1 otherwise)
    i = pl.program_id(1)          # reduction axis ("arbitrary")

    @pl.when(i == 0)
    def _():
        acc_ref[...] = jnp.zeros_like(acc_ref)

    p = p_ref[...].astype(jnp.float32)   # inputs may be bf16; upcast in-kernel
    t = t_ref[...].astype(jnp.float32)
    p = jnp.clip(p, EPS, 1.0 - EPS)

    # Per-class signed weight: built once per step on a single (1, LANES) row
    # (not per element); the CE minus sign is folded in, so the per-element
    # chain is clip, log, mul, sub, sqrt, mul, mul(bcast).
    lane = jax.lax.broadcasted_iota(jnp.int32, (1, LANES), 1)
    w = jnp.where((lane & 1) == 0, -(1.0 - DELTA), -DELTA)   # even lanes = class 0

    one_minus_p = 1.0 - p
    focal = jnp.sqrt(one_minus_p) if GAMMA == 0.5 else jnp.power(one_minus_p, GAMMA)
    contrib = (t * jnp.log(p)) * focal * w

    if needs_mask:
        # Kill BlockSpec edge padding (undefined values) and the clamped spare
        # block of an uneven core split with a single final select; any NaN/Inf
        # in dead rows is discarded by the select.
        row0 = (c * blocks_per_core + i) * block_rows
        rid = row0 + jax.lax.broadcasted_iota(jnp.int32, (block_rows, LANES), 0)
        contrib = jnp.where(rid < rows, contrib, 0.0)

    # Fold the (block_rows, LANES) contribution into the (8, LANES) running sum
    # with pure per-vreg VPU adds; the only cross-lane reduce happens in the
    # wrapper on 2 * 8 * 256 elements.
    acc_ref[...] += jnp.sum(
        contrib.reshape(block_rows // SUBLANES, SUBLANES, LANES), axis=0)

    @pl.when(i == pl.num_programs(1) - 1)
    def _():
        o_ref[...] = acc_ref[...].reshape(1, SUBLANES, LANES)


def symmetric_focal_loss(y_pred, y_true, *, block_rows=None, _force_ncores=None):
    """SymmetricFocalLoss(delta=0.6, gamma=0.5) -- hot path runs in Pallas."""
    assert y_pred.shape == y_true.shape
    assert y_pred.ndim == 4, "expected channel-last 4D tensor (B, H, W, 2)"
    assert y_pred.shape[-1] == 2, "last (class) axis must have size 2"

    ncores, max_block_rows, vmem_limit, dims = _chip_config()
    if _force_ncores is not None:           # test hook: exercise the 2-core grid
        ncores = _force_ncores               # shape even on single-TC chips
        dims = ("arbitrary", "arbitrary")

    n_pix = int(np.prod(y_pred.shape[:-1]))
    m = n_pix * 2
    p = y_pred.reshape(-1)
    t = y_true.reshape(-1)

    # View the interleaved stream as (rows, 256) slabs.  Pad only when needed so
    # rows is sublane-aligned; the pad (p=0.5, t=0) contributes exactly zero, so
    # it needs no masking.  Typical segmentation shapes divide evenly -> free
    # reshape, no extra HBM pass.
    pad_to = SUBLANES * LANES
    if m % pad_to != 0:
        pad = pad_to - m % pad_to
        p = jnp.pad(p, (0, pad), constant_values=0.5)
        t = jnp.pad(t, (0, pad), constant_values=0.0)
        m += pad
    rows = m // LANES
    p2 = p.reshape(rows, LANES)
    t2 = t.reshape(rows, LANES)

    if block_rows is None:
        block_rows = _choose_block_rows(rows, max_block_rows, ncores)
    else:
        block_rows = max(SUBLANES, (min(block_rows, rows) // SUBLANES) * SUBLANES)

    nblocks = pl.cdiv(rows, block_rows)
    bpc = pl.cdiv(nblocks, ncores)            # grid steps per core
    needs_mask = (rows % block_rows != 0) or (ncores * bpc != nblocks)

    def in_map(c, i):
        # Clamp so a core's spare step never requests a fully out-of-range block;
        # the in-kernel mask zeroes its contribution.
        return (jnp.minimum(c * bpc + i, nblocks - 1), 0)

    in_spec = pl.BlockSpec((block_rows, LANES), in_map)
    out_spec = pl.BlockSpec((1, SUBLANES, LANES), lambda c, i: (c, 0, 0))

    kernel = functools.partial(
        _focal_sum_kernel, rows=rows, block_rows=block_rows,
        blocks_per_core=bpc, needs_mask=needs_mask)

    partials = pl.pallas_call(
        kernel,
        out_shape=jax.ShapeDtypeStruct((ncores, SUBLANES, LANES), jnp.float32),
        grid_spec=pltpu.PrefetchScalarGridSpec(
            num_scalar_prefetch=0,
            grid=(ncores, bpc),
            in_specs=[in_spec, in_spec],
            out_specs=out_spec,
            scratch_shapes=[pltpu.VMEM((SUBLANES, LANES), jnp.float32)]),
        compiler_params=pltpu.CompilerParams(
            dimension_semantics=dims,
            vmem_limit_bytes=vmem_limit),
    )(p2, t2)

    # mean over all (B, H, W) positions of (back_ce + fore_ce)
    return jnp.sum(partials) / jnp.float32(n_pix)


def symmetric_unified_focal_loss(y_pred, y_true, weight=WEIGHT, *, block_rows=None):
    # TODO(synk): the reference forward recursively instantiates
    # SymmetricUnifiedFocalLoss for `symmetric_ftl` (upstream bug -- infinite
    # recursion as written; no dice-style Focal-Tversky term is ever computed);
    # its mathematical fixed point equals the SymmetricFocalLoss term, which is
    # what we compute here.
    symmetric_fl = symmetric_focal_loss(y_pred, y_true, block_rows=block_rows)
    symmetric_ftl = symmetric_fl  # recursion fixed point
    if weight is not None:
        return weight * symmetric_ftl + (1.0 - weight) * symmetric_fl
    return symmetric_ftl + symmetric_fl


def _reference_focal(y_pred, y_true):
    """Pure-jnp SymmetricFocalLoss mirroring the PyTorch math."""
    p = jnp.clip(y_pred.astype(jnp.float32), EPS, 1.0 - EPS)
    t = y_true.astype(jnp.float32)
    ce = -t * jnp.log(p)
    back = (1.0 - DELTA) * jnp.power(1.0 - p[..., 0], GAMMA) * ce[..., 0]
    fore = DELTA * jnp.power(1.0 - p[..., 1], GAMMA) * ce[..., 1]
    return jnp.mean(back + fore)


def _reference_loss(y_pred, y_true, weight=WEIGHT):
    fl = _reference_focal(y_pred, y_true)
    ftl = fl  # same fixed-point interpretation as the kernel wrapper
    return weight * ftl + (1.0 - weight) * fl if weight is not None else ftl + fl


def _make_inputs(key, shape):
    k1, k2 = jax.random.split(key)
    logits = jax.random.normal(k1, shape, dtype=jnp.float32)
    y_pred = jax.nn.softmax(logits, axis=-1)
    labels = jax.random.bernoulli(k2, 0.5, shape[:-1]).astype(jnp.int32)
    y_true = jax.nn.one_hot(labels, shape[-1], dtype=jnp.float32)
    return y_pred, y_true


if __name__ == "__main__":
    key = jax.random.PRNGKey(0)
    k1, k2, k3 = jax.random.split(key, 3)

    # 1) Canonical small shape, single-block path (mask off).
    yp, yt = _make_inputs(k1, (2, 16, 16, 2))
    loss = jax.block_until_ready(symmetric_unified_focal_loss(yp, yt))
    np.testing.assert_allclose(np.asarray(loss), np.asarray(_reference_loss(yp, yt)),
                               rtol=1e-5, atol=1e-6)

    # 2) Larger shape: default (divisor-aligned, mask-free) block selection.
    yp, yt = _make_inputs(k2, (2, 64, 64, 2))
    loss = jax.block_until_ready(symmetric_unified_focal_loss(yp, yt))
    np.testing.assert_allclose(np.asarray(loss), np.asarray(_reference_loss(yp, yt)),
                               rtol=1e-5, atol=1e-6)

    # 3) Forced small block (24 rows): exercises the accumulate loop and the
    #    ragged edge-block mask.
    loss = jax.block_until_ready(symmetric_focal_loss(yp, yt, block_rows=24))
    np.testing.assert_allclose(np.asarray(loss), np.asarray(_reference_focal(yp, yt)),
                               rtol=1e-5, atol=1e-6)

    # 4) Two-core grid layout (v7x shape): clamped spare step + edge mask,
    #    forced so it is exercised (sequentially) even on single-TC chips.
    loss = jax.block_until_ready(
        symmetric_focal_loss(yp, yt, block_rows=24, _force_ncores=2))
    np.testing.assert_allclose(np.asarray(loss), np.asarray(_reference_focal(yp, yt)),
                               rtol=1e-5, atol=1e-6)

    # 5) Flattened size not a multiple of 8*256: exercises the tiny pad fallback.
    yp, yt = _make_inputs(k3, (2, 15, 15, 2))
    loss = jax.block_until_ready(symmetric_unified_focal_loss(yp, yt))
    np.testing.assert_allclose(np.asarray(loss), np.asarray(_reference_loss(yp, yt)),
                               rtol=1e-5, atol=1e-6)

    print("KERNEL_OK")
</pallas_src>

<mosaic_0001>
module attributes {stable_mosaic.version = 11 : i64} {
  func.func @_focal_sum_kernel(%arg0: i32, %arg1: i32, %arg2: memref<8x256xf32, #tpu.memory_space<vmem>>, %arg3: memref<8x256xf32, #tpu.memory_space<vmem>>, %arg4: memref<1x8x256xf32, #tpu.memory_space<vmem>>, %arg5: memref<8x256xf32, #tpu.memory_space<vmem>>) attributes {dimension_semantics = [#tpu.dimension_semantics<arbitrary>, #tpu.dimension_semantics<arbitrary>], iteration_bounds = array<i64: 1, 1>, scalar_prefetch = 0 : i64, scratch_operands = 1 : i64, tpu.core_type = #tpu.core_type<tc>, window_params = [{transform_indices = @transform_0, window_bounds = array<i64: 8, 256>}, {transform_indices = @transform_1, window_bounds = array<i64: 8, 256>}, {transform_indices = @transform_2, window_bounds = array<i64: 1, 8, 256>}]} {
    %c0_i32 = arith.constant 0 : i32
    %0 = arith.cmpi eq, %arg1, %c0_i32 : i32
    %1 = arith.extui %0 : i1 to i32
    %c0_i32_0 = arith.constant 0 : i32
    %2 = arith.cmpi ne, %1, %c0_i32_0 : i32
    scf.if %2 {
      %cst_16 = arith.constant 0.000000e+00 : f32
      %33 = vector.broadcast %cst_16 : f32 to vector<8x256xf32>
      %c0_17 = arith.constant 0 : index
      %c0_18 = arith.constant 0 : index
      %34 = vector.load %arg5[%c0_17, %c0_18] : memref<8x256xf32, #tpu.memory_space<vmem>>, vector<8x256xf32>
      tpu.vector_store %arg5[%c0_17, %c0_18], %33 {strides = array<i32>} : memref<8x256xf32, #tpu.memory_space<vmem>>, vector<8x256xf32>,
    } else {
    }
    %c0 = arith.constant 0 : index
    %c0_1 = arith.constant 0 : index
    %3 = vector.load %arg2[%c0, %c0_1] : memref<8x256xf32, #tpu.memory_space<vmem>>, vector<8x256xf32>
    %c0_2 = arith.constant 0 : index
    %c0_3 = arith.constant 0 : index
    %4 = vector.load %arg3[%c0_2, %c0_3] : memref<8x256xf32, #tpu.memory_space<vmem>>, vector<8x256xf32>
    %cst = arith.constant 1.000000e-07 : f32
    %cst_4 = arith.constant 0.99999988 : f32
    %5 = vector.broadcast %cst : f32 to vector<8x256xf32>
    %6 = arith.maximumf %5, %3 : vector<8x256xf32>
    %7 = vector.broadcast %cst_4 : f32 to vector<8x256xf32>
    %8 = arith.minimumf %7, %6 : vector<8x256xf32>
    %9 = tpu.iota {dimensions = array<i32: 1>} : vector<1x256xi32>
    %c1_i32 = arith.constant 1 : i32
    %10 = vector.broadcast %c1_i32 : i32 to vector<1x256xi32>
    %11 = arith.andi %9, %10 : vector<1x256xi32>
    %c0_i32_5 = arith.constant 0 : i32
    %12 = vector.broadcast %c0_i32_5 : i32 to vector<1x256xi32>
    %13 = arith.cmpi eq, %11, %12 : vector<1x256xi32>
    %cst_6 = arith.constant -4.000000e-01 : f32
    %cst_7 = arith.constant -6.000000e-01 : f32
    %14 = vector.broadcast %cst_6 : f32 to vector<1x256xf32>
    %15 = vector.broadcast %cst_7 : f32 to vector<1x256xf32>
    %16 = arith.select %13, %14, %15 : vector<1x256xi1>, vector<1x256xf32>
    %cst_8 = arith.constant 1.000000e+00 : f32
    %17 = vector.broadcast %cst_8 : f32 to vector<8x256xf32>
    %18 = arith.subf %17, %8 : vector<8x256xf32>
    %19 = math.sqrt %18 : vector<8x256xf32>
    %20 = math.log %8 : vector<8x256xf32>
    %21 = arith.mulf %4, %20 : vector<8x256xf32>
    %22 = arith.mulf %21, %19 : vector<8x256xf32>
    %23 = vector.broadcast %16 : vector<1x256xf32> to vector<8x256xf32>
    %24 = arith.mulf %22, %23 : vector<8x256xf32>
    %c0_9 = arith.constant 0 : index
    %c0_10 = arith.constant 0 : index
    %25 = vector.load %arg5[%c0_9, %c0_10] : memref<8x256xf32, #tpu.memory_space<vmem>>, vector<8x256xf32>
    %26 = vector.shape_cast %24 : vector<8x256xf32> to vector<1x8x256xf32>
    %cst_11 = arith.constant dense<0.000000e+00> : vector<8x256xf32>
    %27 = vector.multi_reduction <add>, %26, %cst_11 [0] : vector<1x8x256xf32> to vector<8x256xf32>
    %28 = arith.addf %25, %27 : vector<8x256xf32>
    %c0_12 = arith.constant 0 : index
    %c0_13 = arith.constant 0 : index
    %29 = vector.load %arg5[%c0_12, %c0_13] : memref<8x256xf32, #tpu.memory_space<vmem>>, vector<8x256xf32>
    tpu.vector_store %arg5[%c0_12, %c0_13], %28 {strides = array<i32>} : memref<8x256xf32, #tpu.memory_space<vmem>>, vector<8x256xf32>,
    %c0_i32_14 = arith.constant 0 : i32
    %30 = arith.cmpi eq, %arg1, %c0_i32_14 : i32
    %31 = arith.extui %30 : i1 to i32
    %c0_i32_15 = arith.constant 0 : i32
    %32 = arith.cmpi ne, %31, %c0_i32_15 : i32
    scf.if %32 {
      %c0_16 = arith.constant 0 : index
      %c0_17 = arith.constant 0 : index
      %33 = vector.load %arg5[%c0_16, %c0_17] : memref<8x256xf32, #tpu.memory_space<vmem>>, vector<8x256xf32>
      %34 = vector.shape_cast %33 : vector<8x256xf32> to vector<1x8x256xf32>
      %c0_18 = arith.constant 0 : index
      %c0_19 = arith.constant 0 : index
      %c0_20 = arith.constant 0 : index
      %35 = vector.load %arg4[%c0_18, %c0_19, %c0_20] : memref<1x8x256xf32, #tpu.memory_space<vmem>>, vector<1x8x256xf32>
      tpu.vector_store %arg4[%c0_18, %c0_19, %c0_20], %34 {strides = array<i32>} : memref<1x8x256xf32, #tpu.memory_space<vmem>>, vector<1x8x256xf32>,
    } else {
    }
    return
  }
  func.func @transform_0(%arg0: i32, %arg1: i32) -> (i32, i32) {
    %c1_i32 = arith.constant 1 : i32
    %0 = arith.muli %arg0, %c1_i32 : i32
    %1 = arith.addi %0, %arg1 : i32
    %c0_i32 = arith.constant 0 : i32
    %2 = arith.minsi %1, %c0_i32 : i32
    %c0_i32_0 = arith.constant 0 : i32
    %c0_i32_1 = arith.constant 0 : i32
    return %2, %c0_i32_0 : i32, i32
  }
  func.func @transform_1(%arg0: i32, %arg1: i32) -> (i32, i32) {
    %c1_i32 = arith.constant 1 : i32
    %0 = arith.muli %arg0, %c1_i32 : i32
    %1 = arith.addi %0, %arg1 : i32
    %c0_i32 = arith.constant 0 : i32
    %2 = arith.minsi %1, %c0_i32 : i32
    %c0_i32_0 = arith.constant 0 : i32
    %c0_i32_1 = arith.constant 0 : i32
    return %2, %c0_i32_0 : i32, i32
  }
  func.func @transform_2(%arg0: i32, %arg1: i32) -> (i32, i32, i32) {
    %c0_i32 = arith.constant 0 : i32
    %c0_i32_0 = arith.constant 0 : i32
    %c0_i32_1 = arith.constant 0 : i32
    return %arg0, %c0_i32, %c0_i32_0 : i32, i32, i32
  }
}

</mosaic_0001>

<bundles_post_ra>
// kernel: tpu_custom_call.1
= control target key start
LH: loop header
LB: loop body
LE: loop exit
PB: predicated region body
PF: predicated region fallthrough
CT: control target
= control target key end

     0   :  { %7 = vsyncpa [#allocation4], 0  ;;  %s278_s0 = inlined_call_operand.hbm [shape: f32[8,256], index: 0, kind: input, shape index: {}]   ;;  %s279_s1 = inlined_call_operand.hbm [shape: f32[8,256], index: 1, kind: input, shape index: {}]   ;;  %s280_s2 = inlined_call_operand.hbm [shape: f32[1,8,256], index: 2, kind: output, shape index: {}]  }
   0x1   :  { %8 = vsyncpa [#allocation7], 0 }
   0x2   :  { %9 = vsyncpa [#allocation5], 0  ;;  %s21_s11 = sshll.u32 %s278_s0, 4  ;;  %s244_s12 = smov [#allocation3]   ;;  %s22_s11 = int_to_ptr.hbm [resolvable:$true] %s21_s11 }
   0x3   :  { %s23_s13 = sshll.u32 %s244_s12, 4  ;;  %s38_s16 = sshll.u32 %s279_s1, 4  ;;  %s24_s13 = int_to_ptr.vmem [resolvable:$true] %s23_s13  ;;  %s39_s16 = int_to_ptr.hbm [resolvable:$true] %s38_s16 }
   0x4   :  { %26 = dma.hbm_to_vmem [thread:$0]  %s22_s11, 256, %s24_s13, [#allocation4]  }
   0x5   :  { %s245_s17 = smov [#allocation6]  }
   0x6   :  { %s40_s18 = sshll.u32 %s245_s17, 4  ;;  %s41_s18 = int_to_ptr.vmem [resolvable:$true] %s40_s18 }
   0x7   :  { %43 = dma.hbm_to_vmem [thread:$0]  %s39_s16, 256, %s41_s18, [#allocation7]  }
   0x8   :  { %238 = dma.done.wait [#allocation4], 256  }
   0x9   :  { %239 = vsyncadd [#allocation4], 4294967040 }
   0xa   :  { %240 = dma.done.wait [#allocation7], 256  }
   0xb   :  { %241 = vsyncadd [#allocation7], 4294967040  ;;  %v64_v0 = vld [vmem:[#allocation3] sm:$0xff]  ;;  %v65_v1 = vld [vmem:[#allocation3 + $0x8] sm:$0xff]  ;;  %v72_v8 = vlaneseq  ;;  %v246_v39 = vmov -0.6  }
   0xc   :  { %v68_v2 = vmax.f32 %v64_v0, 1e-07  ;;  %v69_v3 = vmax.f32 %v65_v1, 1e-07  ;;  %v66_v24 = vld [vmem:[#allocation6] sm:$0xff]  ;;  %v67_v30 = vld [vmem:[#allocation6 + $0x8] sm:$0xff] }
   0xd   :  { %v73_v10 = vand.u32 127, %v72_v8  ;;  %s247_s0 = smov [#allocation8]   ;;  %s139_s21 = sshll.u32 %s280_s2, 4  ;;  %s140_s21 = int_to_ptr.hbm [resolvable:$true] %s139_s21 }
   0xe   :  { %v70_v4 = vmin.f32 %v68_v2, 0.9999999  ;;  %v71_v5 = vmin.f32 %v69_v3, 0.9999999  ;;  %s137_s1 = sshll.u32 %s247_s0, 4  ;;  %s138_s1 = int_to_ptr.vmem [resolvable:$true] %s137_s1 }
   0xf   :  { %v74_v16 = vadd.s32 128, %v73_v10  ;;  %v75_v19 = vand.u32 1, %v73_v10 }
  0x10   :  { %v81_v6 = vsub.f32 1.0, %v70_v4  ;;  %v82_v7 = vsub.f32 1.0, %v71_v5 }
  0x11   :  { %v76_v25 = vand.u32 1, %v74_v16  ;;  %vm269_vm0 = vcmp.eq.s32.totalorder %v75_v19, 0 }
  0x12   :  { %158 = vrsqrt.f32 %v81_v6  ;;  %vm90_vm1 = vcmp.eq.f32.partialorder %v81_v6, inf  ;;  %vm92_vm2 = vcmp.eq.f32.partialorder %v81_v6, 0.0  ;;  %v93_v31 = vand.u32 2147483648, %v81_v6 }
  0x13   :  { %160 = vrsqrt.f32 %v82_v7  ;;  %vm102_vm3 = vcmp.eq.f32.partialorder %v82_v7, inf  ;;  %v105_v35 = vand.u32 2147483648, %v82_v7  ;;  %vm78_vm4 = vcmp.eq.s32.totalorder %v76_v25, 0 }
  0x14   :  { %162 = vlog2.f32 %v70_v4  ;;  %vm104_vm5 = vcmp.eq.f32.partialorder %v82_v7, 0.0  ;;  %v79_v40 = vsel %vm269_vm0, -0.4, %v246_v39  ;;  %v80_v44 = vsel %vm78_vm4, -0.4, %v246_v39 }
  0x15   :  { %164 = vlog2.f32 %v71_v5 }
  0x18   :  { %v159_v9 = vpop.eup %158 }
  0x19   :  { %v161_v11 = vpop.eup %160  ;;  %v84_v12 = vmul.f32 %v159_v9, %v81_v6 }
  0x1a   :  { %v96_v13 = vmul.f32 %v161_v11, %v82_v7  ;;  %v163_v15 = vpop.eup %162 }
  0x1b   :  { %v85_v14 = vmul.f32 %v159_v9, %v84_v12  ;;  %v165_v18 = vpop.eup %164  ;;  %v108_v23 = vmul.f32 0.6931472, %v163_v15 }
  0x1c   :  { %v97_v17 = vmul.f32 %v161_v11, %v96_v13  ;;  %v110_v27 = vmul.f32 0.6931472, %v165_v18 }
  0x1d   :  { %v86_v20 = vmul.f32 0.5, %v85_v14  ;;  %v111_v34 = vmul.f32 %v108_v23, %v66_v24 }
  0x1e   :  { %v98_v21 = vmul.f32 0.5, %v97_v17  ;;  %v112_v37 = vmul.f32 %v110_v27, %v67_v30 }
  0x1f   :  { %v87_v22 = vsub.f32 1.5, %v86_v20 }
  0x20   :  { %v99_v26 = vsub.f32 1.5, %v98_v21 }
  0x21   :  { %v88_v29 = vmul.f32 %v159_v9, %v87_v22 }
  0x22   :  { %v100_v32 = vmul.f32 %v161_v11, %v99_v26 }
  0x23   :  { %v89_v33 = vmul.f32 %v88_v29, %v81_v6 }
  0x24   :  { %v101_v36 = vmul.f32 %v100_v32, %v82_v7 }
  0x25   :  { %v91_v38 = vsel %vm90_vm1, %v81_v6, %v89_v33 }
  0x26   :  { %v94_v41 = vsel %vm92_vm2, %v93_v31, %v91_v38  ;;  %v103_v42 = vsel %vm102_vm3, %v82_v7, %v101_v36 }
  0x27   :  { %v113_v43 = vmul.f32 %v111_v34, %v94_v41  ;;  %v106_v45 = vsel %vm104_vm5, %v105_v35, %v103_v42 }
  0x28   :  { %v114_v46 = vmul.f32 %v112_v37, %v106_v45 }
  0x29   :  { %v115_v47 = vmul.f32 %v113_v43, %v79_v40 }
  0x2a   :  { %v116_v48 = vmul.f32 %v114_v46, %v80_v44 }
  0x2b   :  { %130 = vst [vmem:[#allocation8] sm:$0xff] %v115_v47 }
  0x2c   :  { %131 = vst [vmem:[#allocation8 + $0x8] sm:$0xff] %v116_v48 }
  0x2d   :  { %142 = dma.vmem_to_hbm [thread:$0]  %s138_s1, 256, %s140_s21, [#allocation5]  }
  0x2e   :  { %242 = dma.done.wait [#allocation5], 256  }
  0x2f   :  { %243 = vsyncadd [#allocation5], 4294967040 }
  0x30   :  { %147 = vsyncpa [#allocation4], 1 }
  0x31   :  { %148 = vsyncpa [#allocation7], 1 }
  0x32   :  { %149 = vsyncpa [#allocation5], 1 }

</bundles_post_ra>
